<compile_context>
chip_gen: v5e
topology: v5e:2x2
jax: 0.10.0
libtpu: 0.0.40
codegen_flags: <defaults>
</compile_context>

<pallas_src>
import functools

import jax
import jax.numpy as jnp
from jax.experimental import pallas as pl
from jax.experimental.pallas import tpu as pltpu

M_MARGIN = 0.2
S_SCALE = 10.0

_LANE = 128
_MIB = 1024 * 1024
_TILE_BYTES_BIG_VMEM = 16 * _MIB     # chips with >= 96 MiB VMEM (v5e / v6e)
_TILE_BYTES_SMALL_VMEM = 8 * _MIB    # 64-MiB-VMEM chips (v7x) / unknown
_VMEM_RESERVE = 8 * _MIB             # chunk temporaries + Mosaic internal scratch


def _device_vmem_capacity_bytes():
    """Per-core VMEM capacity, with a conservative 64 MiB fallback."""
    try:
        cap = int(pltpu.get_tpu_info().vmem_capacity_bytes)
        if cap > 0:
            return cap
    except Exception:
        pass
    return 64 * _MIB


def _num_tensorcores_per_device():
    """TensorCores one pallas_call can address (1 on v5e/v6e, 2 on v7x)."""
    try:
        dev = jax.devices()[0]
    except Exception:
        return 1
    for attr in ("num_cores", "core_count"):
        val = getattr(dev, attr, None)
        if isinstance(val, int) and val > 0:
            return val
    return 1


def _plan(n, c, itemsize, tile_rows, num_splits):
    """Pick tile rows / in-kernel row chunk / splits / vmem limit for this chip."""
    vmem_cap = _device_vmem_capacity_bytes()
    vmem_limit = vmem_cap * 3 // 4
    tile_cap = (_TILE_BYTES_BIG_VMEM if vmem_cap >= 96 * _MIB
                else _TILE_BYTES_SMALL_VMEM)
    row_bytes = c * itemsize + 4          # one logits row + its int32 target

    if n <= _LANE:
        # Single tiny block: block dims equal the full array dims.
        tile_rows = n
        row_chunk = n
    else:
        if tile_rows is None:
            # Size strictly by bytes: biggest tile whose double-buffered
            # inputs (x tile + lane-dense targets) plus reserve fit under the
            # raised VMEM limit, capped per generation.
            tile_rows = min((vmem_limit - _VMEM_RESERVE) // (2 * row_bytes),
                            tile_cap // row_bytes)
        tile_rows = max(8, int(tile_rows))
        row_chunk = _LANE if tile_rows >= _LANE else (tile_rows // 8) * 8
        # Keep the per-chunk f32 temporaries to a few MiB for very wide C.
        while row_chunk > 8 and 24 * c * row_chunk > 6 * _MIB:
            row_chunk //= 2
        tile_rows = max(row_chunk, (tile_rows // row_chunk) * row_chunk)
        tile_rows = min(tile_rows, max(row_chunk, (n // row_chunk) * row_chunk))

    nblocks = -(-n // tile_rows)
    cores = _num_tensorcores_per_device()
    auto_splits = num_splits is None
    if auto_splits:
        num_splits = cores                # 1 on single-TC chips: no wasted DMA
    splits = max(1, min(int(num_splits), nblocks))
    steps = -(-nblocks // splits)

    if auto_splits and splits > 1 and cores > 1:
        # Multi-TensorCore parts: plain "parallel" does not shard across
        # cores; CORE_PARALLEL does.
        dim_sems = (pltpu.CORE_PARALLEL, pltpu.ARBITRARY)
    else:
        dim_sems = ("parallel", "arbitrary")
    return tile_rows, row_chunk, nblocks, splits, steps, dim_sems, int(vmem_limit)


def _margin_loss_kernel(x_ref, tgt_ref, out_ref, acc_ref, *,
                        n_total, tile_rows, row_chunk, steps, ms):
    p = pl.program_id(0)            # split index (one per TensorCore when > 1)
    i = pl.program_id(1)            # streaming step within the split

    @pl.when(i == 0)
    def _init():
        acc_ref[...] = jnp.zeros_like(acc_ref)

    c = x_ref.shape[-1]
    nchunks = tile_rows // row_chunk

    # Unclamped block index: rows of duplicate (clamped) trailing blocks land
    # past n_total and are masked out below.
    row_base = (p * steps + i) * tile_rows

    # Loop-invariant iotas, hoisted (JAX does not CSE broadcasts inside loops).
    eye = (jax.lax.broadcasted_iota(jnp.int32, (row_chunk, row_chunk), 0) ==
           jax.lax.broadcasted_iota(jnp.int32, (row_chunk, row_chunk), 1))
    class_iota = jax.lax.broadcasted_iota(jnp.int32, (row_chunk, c), 1)
    chunk_rows = jax.lax.broadcasted_iota(jnp.int32, (row_chunk, 1), 0)
    pow2 = (row_chunk & (row_chunk - 1)) == 0

    def chunk_body(k, acc):
        start = k * row_chunk
        if pow2:
            start = pl.multiple_of(start, row_chunk)
        # Native-dtype tile in VMEM; upcast per chunk only.
        x = x_ref[pl.ds(start, row_chunk), :].astype(jnp.float32)      # (R, C)

        # Lane-dense target row for this chunk -> (R, 1) column, via an
        # iota/eye select + lane reduction (no Mosaic relayout required).
        t_row = tgt_ref[0, pl.ds(k, 1), :]                             # (1, R)
        t_col = jnp.sum(
            jnp.where(eye, jnp.broadcast_to(t_row, (row_chunk, row_chunk)), 0),
            axis=1, keepdims=True)                                     # (R, 1)

        onehot = class_iota == t_col                                    # (R, C)
        logits = jnp.where(onehot, x - ms, x)                           # margin-adjusted

        # Numerically stable cross entropy per row: lse(logits) - logits[tgt].
        row_max = jnp.max(logits, axis=-1, keepdims=True)
        lse = row_max + jnp.log(
            jnp.sum(jnp.exp(logits - row_max), axis=-1, keepdims=True))
        tgt_logit = jnp.sum(jnp.where(onehot, logits, 0.0),
                            axis=-1, keepdims=True)
        per_row = lse - tgt_logit                                       # (R, 1)

        # Mask rows past the real batch (partial edge tiles, clamped duplicate
        # blocks).  Masking after the math is safe: rows are independent and
        # where() discards any NaN/Inf produced from padded garbage.
        valid = (row_base + start + chunk_rows) < n_total
        return acc + jnp.where(valid, per_row, 0.0)

    acc = jax.lax.fori_loop(0, nchunks, chunk_body,
                            jnp.zeros((row_chunk, 1), jnp.float32),
                            unroll=min(8, nchunks))
    acc_ref[...] += acc

    @pl.when(i == pl.num_programs(1) - 1)
    def _store():
        out_ref[...] = jnp.sum(acc_ref[...], axis=0,
                               keepdims=True).reshape(1, 1, 1)


def margin_loss(x, target, m=M_MARGIN, s=S_SCALE,
                tile_rows=None, num_splits=None):
    """x: (N, C) float array, target: (N,) int array -> scalar f32 loss."""
    n, c = x.shape
    if not jnp.issubdtype(x.dtype, jnp.floating):
        x = x.astype(jnp.float32)

    (tile_rows, row_chunk, nblocks, splits, steps,
     dim_sems, vmem_limit) = _plan(n, c, jnp.dtype(x.dtype).itemsize,
                                   tile_rows, num_splits)
    nchunks = tile_rows // row_chunk

    # Lane-dense targets: (nblocks, nchunks, row_chunk) int32, zero-padded so
    # each tile's target copy is a single contiguous DMA (vs. the pathological
    # 4-byte-granule strided scatter a (tile_rows, 1) column block would get).
    n_pad = nblocks * tile_rows
    tgt = target.astype(jnp.int32).reshape(-1)
    if n_pad > n:
        tgt = jnp.pad(tgt, (0, n_pad - n))
    tgt3d = tgt.reshape(nblocks, nchunks, row_chunk)

    last_block = nblocks - 1

    def blk(pidx, sidx):
        # Clamp trailing (p, i) slots that overrun the block count; their rows
        # are masked inside the kernel.  (Only happens when splits > 1 and
        # nblocks % splits != 0.)
        return jnp.minimum(pidx * steps + sidx, last_block)

    kernel = functools.partial(
        _margin_loss_kernel, n_total=n, tile_rows=tile_rows,
        row_chunk=row_chunk, steps=steps, ms=float(m) * float(s))

    partial = pl.pallas_call(
        kernel,
        out_shape=jax.ShapeDtypeStruct((splits, 1, 1), jnp.float32),
        grid_spec=pltpu.PrefetchScalarGridSpec(
            num_scalar_prefetch=0,
            grid=(splits, steps),
            in_specs=[
                pl.BlockSpec((tile_rows, c),
                             lambda pidx, sidx: (blk(pidx, sidx), 0)),
                pl.BlockSpec((1, nchunks, row_chunk),
                             lambda pidx, sidx: (blk(pidx, sidx), 0, 0)),
            ],
            out_specs=pl.BlockSpec((1, 1, 1), lambda pidx, sidx: (pidx, 0, 0)),
            scratch_shapes=[pltpu.VMEM((row_chunk, 1), jnp.float32)],
        ),
        compiler_params=pltpu.CompilerParams(
            dimension_semantics=dim_sems,
            vmem_limit_bytes=vmem_limit),
    )(x, tgt3d)

    # Per-split partial sums -> mean over the *global* batch size.
    return jnp.sum(partial) / n


def margin_loss_ref(x, target, m=M_MARGIN, s=S_SCALE):
    """Pure-JAX reference mirroring the PyTorch module."""
    n, c = x.shape
    xf = x.astype(jnp.float32)
    onehot = jax.nn.one_hot(target, c, dtype=jnp.bool_)
    logits = jnp.where(onehot, xf - m * s, xf)
    logz = jax.nn.logsumexp(logits, axis=-1)
    tgt_logit = jnp.take_along_axis(
        logits, target.astype(jnp.int32)[:, None], axis=-1)[:, 0]
    return jnp.mean(logz - tgt_logit)


if __name__ == "__main__":
    k0, k1, k2, k3 = jax.random.split(jax.random.PRNGKey(0), 4)

    # 1) tiny single-block path (block dims == full array dims).
    N, C = 8, 16
    x = jax.random.normal(k0, (N, C), dtype=jnp.float32) * 3.0
    target = jax.random.randint(k1, (N,), 0, C, dtype=jnp.int32)
    loss = jax.block_until_ready(margin_loss(x, target))
    ref = jax.block_until_ready(margin_loss_ref(x, target))
    assert jnp.allclose(loss, ref, rtol=1e-5, atol=1e-5), (loss, ref)

    # 2) multi-block path: partial edge tile + forced 2-way split with a
    #    clamped duplicate block (all masked in-kernel).
    N2, C2 = 300, 16
    x2 = jax.random.normal(k2, (N2, C2), dtype=jnp.float32) * 2.0
    t2 = jax.random.randint(k3, (N2,), 0, C2, dtype=jnp.int32)
    loss2 = jax.block_until_ready(margin_loss(x2, t2, tile_rows=128, num_splits=2))
    ref2 = jax.block_until_ready(margin_loss_ref(x2, t2))
    assert jnp.allclose(loss2, ref2, rtol=1e-5, atol=1e-5), (loss2, ref2)

    # 3) native-dtype (bf16) ingress with auto (byte-budgeted) tiling; the
    #    f32 upcast happens per chunk inside the kernel.
    x3 = x2.astype(jnp.bfloat16)
    loss3 = jax.block_until_ready(margin_loss(x3, t2, num_splits=1))
    ref3 = jax.block_until_ready(margin_loss_ref(x3.astype(jnp.float32), t2))
    assert jnp.allclose(loss3, ref3, rtol=1e-4, atol=1e-4), (loss3, ref3)

    print("KERNEL_OK")
</pallas_src>

<mosaic_0001>
module attributes {stable_mosaic.version = 11 : i64} {
  func.func @_margin_loss_kernel(%arg0: i32, %arg1: i32, %arg2: memref<8x16xf32, #tpu.memory_space<vmem>>, %arg3: memref<1x1x8xi32, #tpu.memory_space<vmem>>, %arg4: memref<1x1x1xf32, #tpu.memory_space<vmem>>, %arg5: memref<8x1xf32, #tpu.memory_space<vmem>>) attributes {dimension_semantics = [#tpu.dimension_semantics<parallel>, #tpu.dimension_semantics<arbitrary>], iteration_bounds = array<i64: 1, 1>, scalar_prefetch = 0 : i64, scratch_operands = 1 : i64, tpu.core_type = #tpu.core_type<tc>, window_params = [{transform_indices = @transform_0, window_bounds = array<i64: 8, 16>}, {transform_indices = @transform_1, window_bounds = array<i64: 1, 1, 8>}, {transform_indices = @transform_2, window_bounds = array<i64: 1, 1, 1>}]} {
    %c0_i32 = arith.constant 0 : i32
    %0 = arith.cmpi eq, %arg1, %c0_i32 : i32
    %1 = arith.extui %0 : i1 to i32
    %c0_i32_0 = arith.constant 0 : i32
    %2 = arith.cmpi ne, %1, %c0_i32_0 : i32
    scf.if %2 {
      %cst_21 = arith.constant 0.000000e+00 : f32
      %58 = vector.broadcast %cst_21 : f32 to vector<8x1xf32>
      %c0_22 = arith.constant 0 : index
      %c0_23 = arith.constant 0 : index
      %59 = vector.load %arg5[%c0_22, %c0_23] : memref<8x1xf32, #tpu.memory_space<vmem>>, vector<8x1xf32>
      tpu.vector_store %arg5[%c0_22, %c0_23], %58 {strides = array<i32>} : memref<8x1xf32, #tpu.memory_space<vmem>>, vector<8x1xf32>,
    } else {
    }
    %c1_i32 = arith.constant 1 : i32
    %3 = arith.muli %arg0, %c1_i32 : i32
    %4 = arith.addi %3, %arg1 : i32
    %c8_i32 = arith.constant 8 : i32
    %5 = arith.muli %4, %c8_i32 : i32
    %6 = tpu.iota {dimensions = array<i32: 0>} : vector<8x8xi32>
    %7 = tpu.iota {dimensions = array<i32: 1>} : vector<8x8xi32>
    %8 = arith.cmpi eq, %6, %7 : vector<8x8xi32>
    %9 = tpu.iota {dimensions = array<i32: 1>} : vector<8x16xi32>
    %10 = tpu.iota {dimensions = array<i32: 0>} : vector<8x1xi32>
    %cst = arith.constant 0.000000e+00 : f32
    %11 = vector.broadcast %cst : f32 to vector<8x1xf32>
    %c0_i32_1 = arith.constant 0 : i32
    %c8_i32_2 = arith.constant 8 : i32
    %12 = arith.muli %c0_i32_1, %c8_i32_2 : i32
    %13 = tpu.assume_multiple %12, 8 : i32
    %14 = arith.index_cast %13 : i32 to index
    %c0 = arith.constant 0 : index
    %15 = vector.load %arg2[%14, %c0] : memref<8x16xf32, #tpu.memory_space<vmem>>, vector<8x16xf32>
    %c0_3 = arith.constant 0 : index
    %16 = arith.index_cast %c0_i32_1 : i32 to index
    %c0_4 = arith.constant 0 : index
    %17 = vector.load %arg3[%c0_3, %16, %c0_4] : memref<1x1x8xi32, #tpu.memory_space<vmem>>, vector<1x1x8xi32>
    %18 = vector.shape_cast %17 : vector<1x1x8xi32> to vector<1x8xi32>
    %19 = vector.shape_cast %18 : vector<1x8xi32> to vector<1x8xi32>
    %20 = vector.broadcast %19 : vector<1x8xi32> to vector<8x8xi32>
    %c0_i32_5 = arith.constant 0 : i32
    %21 = vector.broadcast %c0_i32_5 : i32 to vector<8x8xi32>
    %22 = arith.select %8, %20, %21 : vector<8x8xi1>, vector<8x8xi32>
    %cst_6 = arith.constant dense<0> : vector<8xi32>
    %23 = vector.multi_reduction <add>, %22, %cst_6 [1] : vector<8x8xi32> to vector<8xi32>
    %24 = vector.shape_cast %23 : vector<8xi32> to vector<8x1xi32>
    %25 = vector.broadcast %24 : vector<8x1xi32> to vector<8x16xi32>
    %26 = arith.cmpi eq, %9, %25 : vector<8x16xi32>
    %cst_7 = arith.constant 2.000000e+00 : f32
    %27 = vector.broadcast %cst_7 : f32 to vector<8x16xf32>
    %28 = arith.subf %15, %27 : vector<8x16xf32>
    %29 = arith.select %26, %28, %15 : vector<8x16xi1>, vector<8x16xf32>
    %cst_8 = arith.constant dense<0xFF800000> : vector<8xf32>
    %30 = vector.multi_reduction <maximumf>, %29, %cst_8 [1] : vector<8x16xf32> to vector<8xf32>
    %31 = vector.shape_cast %30 : vector<8xf32> to vector<8x1xf32>
    %32 = vector.broadcast %31 : vector<8x1xf32> to vector<8x16xf32>
    %33 = arith.subf %29, %32 : vector<8x16xf32>
    %34 = math.exp %33 : vector<8x16xf32>
    %cst_9 = arith.constant dense<0.000000e+00> : vector<8xf32>
    %35 = vector.multi_reduction <add>, %34, %cst_9 [1] : vector<8x16xf32> to vector<8xf32>
    %36 = vector.shape_cast %35 : vector<8xf32> to vector<8x1xf32>
    %37 = math.log %36 : vector<8x1xf32>
    %38 = arith.addf %31, %37 : vector<8x1xf32>
    %cst_10 = arith.constant 0.000000e+00 : f32
    %39 = vector.broadcast %cst_10 : f32 to vector<8x16xf32>
    %40 = arith.select %26, %29, %39 : vector<8x16xi1>, vector<8x16xf32>
    %cst_11 = arith.constant dense<0.000000e+00> : vector<8xf32>
    %41 = vector.multi_reduction <add>, %40, %cst_11 [1] : vector<8x16xf32> to vector<8xf32>
    %42 = vector.shape_cast %41 : vector<8xf32> to vector<8x1xf32>
    %43 = arith.subf %38, %42 : vector<8x1xf32>
    %44 = arith.addi %5, %13 : i32
    %45 = vector.broadcast %44 : i32 to vector<8x1xi32>
    %46 = arith.addi %45, %10 : vector<8x1xi32>
    %c8_i32_12 = arith.constant 8 : i32
    %47 = vector.broadcast %c8_i32_12 : i32 to vector<8x1xi32>
    %48 = arith.cmpi slt, %46, %47 : vector<8x1xi32>
    %cst_13 = arith.constant 0.000000e+00 : f32
    %49 = vector.broadcast %cst_13 : f32 to vector<8x1xf32>
    %50 = arith.select %48, %43, %49 : vector<8x1xi1>, vector<8x1xf32>
    %51 = arith.addf %11, %50 : vector<8x1xf32>
    %c1_i32_14 = arith.constant 1 : i32
    %c0_15 = arith.constant 0 : index
    %c0_16 = arith.constant 0 : index
    %52 = vector.load %arg5[%c0_15, %c0_16] : memref<8x1xf32, #tpu.memory_space<vmem>>, vector<8x1xf32>
    %53 = arith.addf %52, %51 : vector<8x1xf32>
    %c0_17 = arith.constant 0 : index
    %c0_18 = arith.constant 0 : index
    %54 = vector.load %arg5[%c0_17, %c0_18] : memref<8x1xf32, #tpu.memory_space<vmem>>, vector<8x1xf32>
    tpu.vector_store %arg5[%c0_17, %c0_18], %53 {strides = array<i32>} : memref<8x1xf32, #tpu.memory_space<vmem>>, vector<8x1xf32>,
    %c0_i32_19 = arith.constant 0 : i32
    %55 = arith.cmpi eq, %arg1, %c0_i32_19 : i32
    %56 = arith.extui %55 : i1 to i32
    %c0_i32_20 = arith.constant 0 : i32
    %57 = arith.cmpi ne, %56, %c0_i32_20 : i32
    scf.if %57 {
      %c0_21 = arith.constant 0 : index
      %c0_22 = arith.constant 0 : index
      %58 = vector.load %arg5[%c0_21, %c0_22] : memref<8x1xf32, #tpu.memory_space<vmem>>, vector<8x1xf32>
      %cst_23 = arith.constant dense<0.000000e+00> : vector<1xf32>
      %59 = vector.multi_reduction <add>, %58, %cst_23 [0] : vector<8x1xf32> to vector<1xf32>
      %60 = vector.shape_cast %59 : vector<1xf32> to vector<1x1xf32>
      %61 = vector.shape_cast %60 : vector<1x1xf32> to vector<1x1x1xf32>
      %c0_24 = arith.constant 0 : index
      %c0_25 = arith.constant 0 : index
      %c0_26 = arith.constant 0 : index
      %62 = vector.load %arg4[%c0_24, %c0_25, %c0_26] : memref<1x1x1xf32, #tpu.memory_space<vmem>>, vector<1x1x1xf32>
      tpu.vector_store %arg4[%c0_24, %c0_25, %c0_26], %61 {strides = array<i32>} : memref<1x1x1xf32, #tpu.memory_space<vmem>>, vector<1x1x1xf32>,
    } else {
    }
    return
  }
  func.func @transform_0(%arg0: i32, %arg1: i32) -> (i32, i32) {
    %c1_i32 = arith.constant 1 : i32
    %0 = arith.muli %arg0, %c1_i32 : i32
    %1 = arith.addi %0, %arg1 : i32
    %c0_i32 = arith.constant 0 : i32
    %2 = arith.minsi %1, %c0_i32 : i32
    %c0_i32_0 = arith.constant 0 : i32
    %c0_i32_1 = arith.constant 0 : i32
    return %2, %c0_i32_0 : i32, i32
  }
  func.func @transform_1(%arg0: i32, %arg1: i32) -> (i32, i32, i32) {
    %c1_i32 = arith.constant 1 : i32
    %0 = arith.muli %arg0, %c1_i32 : i32
    %1 = arith.addi %0, %arg1 : i32
    %c0_i32 = arith.constant 0 : i32
    %2 = arith.minsi %1, %c0_i32 : i32
    %c0_i32_0 = arith.constant 0 : i32
    %c0_i32_1 = arith.constant 0 : i32
    %c0_i32_2 = arith.constant 0 : i32
    return %2, %c0_i32_0, %c0_i32_1 : i32, i32, i32
  }
  func.func @transform_2(%arg0: i32, %arg1: i32) -> (i32, i32, i32) {
    %c0_i32 = arith.constant 0 : i32
    %c0_i32_0 = arith.constant 0 : i32
    %c0_i32_1 = arith.constant 0 : i32
    return %arg0, %c0_i32, %c0_i32_0 : i32, i32, i32
  }
}

</mosaic_0001>

<bundles_post_ra>
// kernel: tpu_custom_call.1
= control target key start
LH: loop header
LB: loop body
LE: loop exit
PB: predicated region body
PF: predicated region fallthrough
CT: control target
= control target key end

     0   :  { %7 = vsyncpa [#allocation4], 0  ;;  %s273_s0 = inlined_call_operand.hbm [shape: f32[8,16], index: 0, kind: input, shape index: {}]   ;;  %s274_s1 = inlined_call_operand.hbm [shape: s32[1,1,8], index: 1, kind: input, shape index: {}]   ;;  %s275_s2 = inlined_call_operand.hbm [shape: f32[1,1,1], index: 2, kind: output, shape index: {}]  }
   0x1   :  { %8 = vsyncpa [#allocation7], 0 }
   0x2   :  { %9 = vsyncpa [#allocation5], 0  ;;  %s20_s11 = sshll.u32 %s273_s0, 4  ;;  %s239_s12 = smov [#allocation3]   ;;  %s21_s11 = int_to_ptr.hbm [resolvable:$true] %s20_s11 }
   0x3   :  { %s22_s13 = sshll.u32 %s239_s12, 4  ;;  %s35_s16 = sshll.u32 %s274_s1, 4  ;;  %s23_s13 = int_to_ptr.vmem [resolvable:$true] %s22_s13  ;;  %s36_s16 = int_to_ptr.hbm [resolvable:$true] %s35_s16 }
   0x4   :  { %25 = dma.hbm_to_vmem [thread:$0]  %s21_s11, 128, %s23_s13, [#allocation4]  }
   0x5   :  { %s240_s17 = smov [#allocation6]  }
   0x6   :  { %s37_s18 = sshll.u32 %s240_s17, 4  ;;  %s38_s18 = int_to_ptr.vmem [resolvable:$true] %s37_s18 }
   0x7   :  { %40 = dma.hbm_to_vmem [thread:$0]  %s36_s16, 16, %s38_s18, [#allocation7]  }
   0x8   :  { %233 = dma.done.wait [#allocation4], 128  }
   0x9   :  { %234 = vsyncadd [#allocation4], 4294967168 }
   0xa   :  { %235 = dma.done.wait [#allocation7], 16  }
   0xb   :  { %236 = vsyncadd [#allocation7], 4294967280  ;;  %v63_v0 = vlaneseq  ;;  %v156_v3 = vld [vmem:[#allocation6] ss:$0 sm:$0xff]  ;;  %vm72_vm1 = vcmask 64512   ;;  %v68_v12 = vld [vmem:[#allocation3] sm:$0xff] }
   0xc   :  { %v151_v16 = vadd.f32 -2.0, %v68_v12  ;;  %vm89_vm2 = vcmask 130048   ;;  %vm59_vm4 = vcmask 7168   ;;  %v241_v22 = vmov 0.0   ;;  %s242_s0 = smov [#allocation8]   ;;  %s137_s21 = sshll.u32 %s275_s2, 4  ;;  %s138_s21 = int_to_ptr.hbm [resolvable:$true] %s137_s21 }
   0xd   :  { %v64_v1 = vshrl.u32 %v63_v0, 7  ;;  %v66_v2 = vand.u32 127, %v63_v0  ;;  %60 = vst.msk [vmem:[#allocation2] sm:$0xff] %vm59_vm4, %v241_v22  ;;  %s135_s1 = sshll.u32 %s242_s0, 4  ;;  %vm128_vm5 = vcmask 0   ;;  %s136_s1 = int_to_ptr.vmem [resolvable:$true] %s135_s1 }
   0xf   :  { %vm67_vm0 = vcmp.eq.s32.totalorder %v64_v1, %v66_v2 }
  0x10   :  { %v71_v4 = vsel %vm67_vm0, %v156_v3, 0 }
  0x11   :  { %v73_v5 = vsel %vm72_vm1, %v71_v4, 0 }
  0x12   :  { %v75_v6 = vshrl.u32 %v73_v5, 16  ;;  %v74_v8 = vand.u32 65535, %v73_v5 }
  0x14   :  { %v77_v7 = vcvt.s32.f32 %v75_v6  ;;  %v76_v9 = vcvt.s32.f32 %v74_v8  ;;  %v113_v33 = vld [vmem:[#allocation2] sm:$0xff] }
  0x16   :  { %80 = vadd.xlane.f32.xlu0 %v77_v7 }
  0x1e   :  { %78 = vadd.xlane.f32.xlu0 %v76_v9 }
  0x89   :  { %v81_v10 = vpop.xlane.xlu0 %80 }
  0x8a   :  { %v83_v11 = vcvt.f32.s32 %v81_v10 }
  0x8c   :  { %v84_v14 = vshll.u32 %v83_v11, 16 }
  0x91   :  { %v79_v13 = vpop.xlane.xlu0 %78 }
  0x92   :  { %v82_v15 = vcvt.f32.s32 %v79_v13 }
  0x94   :  { %v85_v17 = vadd.s32 %v84_v14, %v82_v15 }
  0x96   :  { %vm86_vm3 = vcmp.eq.s32.totalorder %v66_v2, %v85_v17 }
  0x97   :  { %v102_v18 = vsel %vm86_vm3, %v151_v16, 0.0  ;;  %v88_v19 = vsel %vm86_vm3, %v151_v16, %v68_v12 }
  0x98   :  { %v103_v20 = vsel %vm89_vm2, %v102_v18, 0.0  ;;  %v90_v21 = vsel %vm89_vm2, %v88_v19, -inf }
  0x99   :  { %104 = vadd.xlane.f32.xlu2 %v103_v20  ;;  %91 = vmax.xlane.f32.xlu1 %v90_v21 }
 0x10c   :  { %v92_v23 = vpop.xlane.xlu1 %91  ;;  %v105_v32 = vpop.xlane.xlu2 %104 }
 0x10d   :  { %v93_v24 = vsub.f32 %v88_v19, %v92_v23 }
 0x10f   :  { %v94_v25 = vmul.f32 1.442695, %v93_v24 }
 0x111   :  { %157 = vpow2.f32 %v94_v25 }
 0x117   :  { %v158_v26 = vpop.eup %157 }
 0x118   :  { %v96_v27 = vsel %vm89_vm2, %v158_v26, 0.0 }
 0x119   :  { %97 = vadd.xlane.f32.xlu1 %v96_v27 }
 0x18c   :  { %v98_v28 = vpop.xlane.xlu1 %97 }
 0x18d   :  { %159 = vlog2.f32 %v98_v28 }
 0x193   :  { %v160_v29 = vpop.eup %159 }
 0x194   :  { %v100_v30 = vmul.f32 0.6931472, %v160_v29 }
 0x196   :  { %v101_v31 = vadd.f32 %v100_v30, %v92_v23 }
 0x198   :  { %v106_v34 = vsub.f32 %v101_v31, %v105_v32 }
 0x19a   :  { %v114_v35 = vadd.f32 %v113_v33, %v106_v34 }
 0x19c   :  { %116 = vst.msk [vmem:[#allocation2] sm:$0xff] %vm59_vm4, %v114_v35 }
 0x1a3   :  { %v120_v36 = vld [vmem:[#allocation2] sm:$0xff] }
 0x1a4   :  { %v121_v37 = vsel %vm59_vm4, %v120_v36, 0.0 }
 0x1a5   :  { %v122_v38 = vrot.slane %v121_v37, 4 }
 0x1a7   :  { %v123_v39 = vadd.f32 %v122_v38, %v121_v37 }
 0x1a9   :  { %v124_v40 = vrot.slane %v123_v39, 2 }
 0x1ab   :  { %v125_v41 = vadd.f32 %v124_v40, %v123_v39 }
 0x1ad   :  { %v126_v42 = vrot.slane %v125_v41, 1 }
 0x1af   :  { %v127_v43 = vadd.f32 %v126_v42, %v125_v41 }
 0x1b1   :  { %129 = vst.msk [vmem:[#allocation8] sm:$0x1] %vm128_vm5, %v127_v43 }
 0x1b2   :  { %140 = dma.vmem_to_hbm [thread:$0]  %s136_s1, 16, %s138_s21, [#allocation5]  }
 0x1b3   :  { %237 = dma.done.wait [#allocation5], 16  }
 0x1b4   :  { %238 = vsyncadd [#allocation5], 4294967280 }
 0x1b5   :  { %145 = vsyncpa [#allocation4], 1 }
 0x1b6   :  { %146 = vsyncpa [#allocation7], 1 }
 0x1b7   :  { %147 = vsyncpa [#allocation5], 1 }

</bundles_post_ra>
